<compile_context>
chip_gen: v7x
topology: tpu7x:2x2x1
jax: 0.10.0
libtpu: 0.0.40
codegen_flags: <defaults>
</compile_context>

<pallas_src>
import jax
import jax.numpy as jnp
from jax.experimental import pallas as pl
from jax.experimental.pallas import tpu as pltpu


def _decoder_kernel(x_ref, w1_ref, w2_ref, vec_ref, out_ref):
    """Fused MLP decoder: [Linear+LeakyReLU] x2, then Linear(->1)+Sigmoid, lane-dense output."""
    h2_dim = w2_ref.shape[1]                      # 64

    # Packed small-vector slab: ONE full-row load, value-level static slices afterwards.
    vec = vec_ref[...]                            # (4, H1) f32
    b1 = vec[0:1, :]                              # (1, H1)
    b2 = vec[1:2, :h2_dim]                        # (1, H2)
    w3 = vec[2:3, :h2_dim]                        # (1, H2)  == W3[:, 0] laid out as a row
    b3 = vec[3:4, 0:1]                            # (1, 1)

    # Layer 1: Linear(F -> H1) + LeakyReLU(0.2). bf16 MXU inputs, f32 accumulate / activations.
    x = x_ref[...].astype(jnp.bfloat16)           # per-tile cast (no wrapper-side HBM pass)
    h1 = jnp.dot(x, w1_ref[...], preferred_element_type=jnp.float32) + b1
    h1 = jnp.maximum(h1, 0.2 * h1)                # LeakyReLU(0.2), VPU, f32

    # Layer 2: Linear(H1 -> H2) + LeakyReLU(0.2)
    h2 = jnp.dot(h1.astype(jnp.bfloat16), w2_ref[...],
                 preferred_element_type=jnp.float32) + b2
    h2 = jnp.maximum(h2, 0.2 * h2)

    # Layer 3: Linear(H2 -> 1) computed transposed so the result is lane-dense:
    #   z = w3_row (1,H2) @ h2^T (H2,tb) -> (1, tb).  exp / reciprocal / store then all run
    # on dense vregs, and each tile does a single unmasked (1, tb) store.
    z = jnp.dot(w3, h2.T, preferred_element_type=jnp.float32) + b3        # (1, tb) f32
    out_ref[...] = pl.reciprocal(1.0 + jnp.exp(-z), approx=True)          # sigmoid on the EUP
    # (use approx=False if exactly calibrated probabilities matter; this passes ~1e-3 abs)


def _vmem_bytes(tb, f, h1d, h2d, x_itemsize):
    """Rough per-grid-step VMEM footprint (double-buffered blocks + live values)."""
    bufs = 2 * (tb * f * x_itemsize       # x tile
                + f * h1d * 2             # W1 (bf16)
                + h1d * h2d * 2           # W2 (bf16)
                + 4 * h1d * 4             # packed vector slab (f32)
                + tb * 4)                 # (1, tb) f32 output tile
    live = tb * (2 * f + 6 * h1d + 8 * h2d + 8)   # x bf16, h1 f32+bf16, h2 f32 + h2^T, z
    return bufs + live


def interaction_decoder_improved(x, params):
    """Forward pass of InteractionDecoderImproved. x: (B, in_channels) -> (B, 1)."""
    w1, b1 = params["w1"], params["b1"]           # (F, H1), (H1,)
    w2, b2 = params["w2"], params["b2"]           # (H1, H2), (H2,)
    w3, b3 = params["w3"], params["b3"]           # (H2, 1), (1,)

    b, f = x.shape
    h1d = w1.shape[1]
    h2d = w2.shape[1]
    assert w1.shape[0] == f and b >= 1
    assert w3.shape == (h2d, 1), "kernel is specialized for out_channels=1 (module default)"
    assert h2d <= h1d

    # Pack all small vectors into one (4, H1) slab -> a single resident input buffer.
    def _row(v):
        v = v.reshape(-1).astype(jnp.float32)
        return jnp.pad(v, (0, h1d - v.shape[0]))
    vec = jnp.stack([_row(b1), _row(b2), _row(w3[:, 0]), _row(b3)], axis=0)   # (4, H1) f32

    # Batch tiling: large, VMEM-budgeted tiles; >= 2 grid steps whenever B > 512 (v7x cores).
    budget = 24 * 1024 * 1024
    xi = x.dtype.itemsize
    if b <= 512:
        tb = b                                     # single full-array tile, no padding needed
    else:
        tb = 2048 if b >= 8192 else (1024 if b >= 2048 else 512)
        while tb > 128 and _vmem_bytes(tb, f, h1d, h2d, xi) > budget:
            tb //= 2                               # stays a multiple of 128
    n_tiles = pl.cdiv(b, tb)

    est = _vmem_bytes(tb, f, h1d, h2d, xi)
    vmem_limit = None
    if est > 12 * 1024 * 1024:                     # above the smallest default scoped limit
        vmem_limit = int(min(est + 8 * 1024 * 1024, 40 * 1024 * 1024))

    cost = pl.CostEstimate(
        flops=2 * b * (f * h1d + h1d * h2d + h2d),
        transcendentals=2 * b,                     # exp + reciprocal per row
        bytes_accessed=(b * f * xi + f * h1d * 2 + h1d * h2d * 2
                        + 4 * h1d * 4 + n_tiles * tb * 4),
    )

    out = pl.pallas_call(
        _decoder_kernel,
        out_shape=jax.ShapeDtypeStruct((1, n_tiles * tb), jnp.float32),   # lane-dense output
        grid_spec=pltpu.PrefetchScalarGridSpec(
            num_scalar_prefetch=0,
            grid=(n_tiles,),
            in_specs=[
                pl.BlockSpec((tb, f), lambda i: (i, 0)),        # x row tiles (partial tail OK)
                pl.BlockSpec((f, h1d), lambda i: (0, 0)),       # W1 resident (bf16, tiny)
                pl.BlockSpec((h1d, h2d), lambda i: (0, 0)),     # W2 resident (bf16, tiny)
                pl.BlockSpec((4, h1d), lambda i: (0, 0)),       # packed b1/b2/W3/b3 slab
            ],
            out_specs=pl.BlockSpec((1, tb), lambda i: (0, i)),  # lane-dense (1, tb) stores
        ),
        compiler_params=pltpu.CompilerParams(
            dimension_semantics=("parallel",),
            vmem_limit_bytes=vmem_limit,
        ),
        cost_estimate=cost,
    )(x, w1.astype(jnp.bfloat16), w2.astype(jnp.bfloat16), vec)

    return out[0, :b].reshape(b, 1)


def init_params(key, in_channels, hidden_dims=(256, 64), out_channels=1):
    """Weights stored [in_features, out_features] (transposed vs. torch.nn.Linear.weight)."""
    assert out_channels == 1, "kernel is specialized for the module default out_channels=1"
    h1, h2 = hidden_dims
    ks = jax.random.split(key, 6)

    def lin(k, fi, fo):
        return jax.random.normal(k, (fi, fo), jnp.float32) / jnp.sqrt(fi)

    def bias(k, fo):
        return 0.05 * jax.random.normal(k, (fo,), jnp.float32)

    return dict(
        w1=lin(ks[0], in_channels, h1), b1=bias(ks[1], h1),
        w2=lin(ks[2], h1, h2),          b2=bias(ks[3], h2),
        w3=lin(ks[4], h2, out_channels), b3=bias(ks[5], out_channels),
    )


def _reference_f32(x, p):
    """Pure-JAX f32 reference (matches the torch module numerics)."""
    h = x @ p["w1"] + p["b1"]
    h = jnp.where(h >= 0, h, 0.2 * h)
    h = h @ p["w2"] + p["b2"]
    h = jnp.where(h >= 0, h, 0.2 * h)
    return jax.nn.sigmoid(h @ p["w3"] + p["b3"])


def _reference_mixed(x, p):
    """Reference mirroring the kernel's precision: bf16 MXU inputs, f32 accumulation."""
    bf = jnp.bfloat16
    h = jnp.dot(x.astype(bf), p["w1"].astype(bf), preferred_element_type=jnp.float32) + p["b1"]
    h = jnp.maximum(h, 0.2 * h)
    h = jnp.dot(h.astype(bf), p["w2"].astype(bf), preferred_element_type=jnp.float32) + p["b2"]
    h = jnp.maximum(h, 0.2 * h)
    return jax.nn.sigmoid(jnp.dot(h, p["w3"]) + p["b3"])


if __name__ == "__main__":
    key = jax.random.PRNGKey(0)
    k_x, k_p, k_x2 = jax.random.split(key, 3)

    B, IN_CH = 16, 64                              # small shapes consistent with the decoder
    x = jax.random.normal(k_x, (B, IN_CH), jnp.float32)
    params = init_params(k_p, IN_CH, hidden_dims=(256, 64), out_channels=1)

    fwd = jax.jit(interaction_decoder_improved)

    out = jax.block_until_ready(fwd(x, params))
    assert out.shape == (B, 1) and out.dtype == jnp.float32
    assert bool(jnp.all((out >= 0.0) & (out <= 1.0)))
    err_mixed = float(jnp.max(jnp.abs(out - _reference_mixed(x, params))))
    err_f32 = float(jnp.max(jnp.abs(out - _reference_f32(x, params))))
    assert err_mixed < 5e-3, f"mismatch vs precision-matched reference: {err_mixed}"
    assert err_f32 < 5e-2, f"mismatch vs f32 reference: {err_f32}"

    # Also exercise the multi-tile path with a ragged (non-multiple-of-tile) batch:
    # B2 > 512 -> tb=512, 2 grid steps, partial trailing input block (tail rows discarded).
    B2 = 600
    x2 = jax.random.normal(k_x2, (B2, IN_CH), jnp.float32)
    out2 = jax.block_until_ready(fwd(x2, params))
    err2 = float(jnp.max(jnp.abs(out2 - _reference_mixed(x2, params))))
    assert out2.shape == (B2, 1) and err2 < 5e-3, f"multi-tile mismatch: {err2}"

    print("KERNEL_OK")
</pallas_src>

<mosaic_0001>
module attributes {stable_mosaic.version = 11 : i64} {
  func.func @_decoder_kernel(%arg0: i32, %arg1: memref<16x64xf32, #tpu.memory_space<vmem>>, %arg2: memref<64x256xbf16, #tpu.memory_space<vmem>>, %arg3: memref<256x64xbf16, #tpu.memory_space<vmem>>, %arg4: memref<4x256xf32, #tpu.memory_space<vmem>>, %arg5: memref<1x16xf32, #tpu.memory_space<vmem>>) attributes {dimension_semantics = [#tpu.dimension_semantics<parallel>], iteration_bounds = array<i64: 1>, scalar_prefetch = 0 : i64, scratch_operands = 0 : i64, tpu.core_type = #tpu.core_type<tc>, window_params = [{transform_indices = @transform_0, window_bounds = array<i64: 16, 64>}, {pipeline_mode = #tpu.pipeline_mode<synchronous>, transform_indices = @transform_1, window_bounds = array<i64: 64, 256>}, {pipeline_mode = #tpu.pipeline_mode<synchronous>, transform_indices = @transform_2, window_bounds = array<i64: 256, 64>}, {pipeline_mode = #tpu.pipeline_mode<synchronous>, transform_indices = @transform_3, window_bounds = array<i64: 4, 256>}, {transform_indices = @transform_4, window_bounds = array<i64: 1, 16>}]} {
    %c0 = arith.constant 0 : index
    %c0_0 = arith.constant 0 : index
    %0 = vector.load %arg4[%c0, %c0_0] : memref<4x256xf32, #tpu.memory_space<vmem>>, vector<4x256xf32>
    %1 = vector.extract_strided_slice %0 {offsets = [0, 0], sizes = [1, 256], strides = [1, 1]} : vector<4x256xf32> to vector<1x256xf32>
    %2 = vector.extract_strided_slice %0 {offsets = [1, 0], sizes = [1, 64], strides = [1, 1]} : vector<4x256xf32> to vector<1x64xf32>
    %3 = vector.extract_strided_slice %0 {offsets = [2, 0], sizes = [1, 64], strides = [1, 1]} : vector<4x256xf32> to vector<1x64xf32>
    %4 = vector.extract_strided_slice %0 {offsets = [3, 0], sizes = [1, 1], strides = [1, 1]} : vector<4x256xf32> to vector<1x1xf32>
    %c0_1 = arith.constant 0 : index
    %c0_2 = arith.constant 0 : index
    %5 = vector.load %arg1[%c0_1, %c0_2] : memref<16x64xf32, #tpu.memory_space<vmem>>, vector<16x64xf32>
    %6 = arith.truncf %5 : vector<16x64xf32> to vector<16x64xbf16>
    %c0_3 = arith.constant 0 : index
    %c0_4 = arith.constant 0 : index
    %7 = vector.load %arg2[%c0_3, %c0_4] : memref<64x256xbf16, #tpu.memory_space<vmem>>, vector<64x256xbf16>
    %cst = arith.constant dense<0.000000e+00> : vector<16x256xf32>
    %8 = tpu.matmul %6, %7, %cst {dimension_numbers = #tpu.dot_dimension_numbers<[1], [0], [0], [1], [0, 0, 1, 1], [], []>} : vector<16x64xbf16>, vector<64x256xbf16>, vector<16x256xf32> -> vector<16x256xf32>
    %9 = vector.broadcast %1 : vector<1x256xf32> to vector<16x256xf32>
    %10 = arith.addf %8, %9 : vector<16x256xf32>
    %cst_5 = arith.constant 2.000000e-01 : f32
    %11 = vector.broadcast %cst_5 : f32 to vector<16x256xf32>
    %12 = arith.mulf %11, %10 : vector<16x256xf32>
    %13 = arith.maximumf %10, %12 : vector<16x256xf32>
    %14 = arith.truncf %13 : vector<16x256xf32> to vector<16x256xbf16>
    %c0_6 = arith.constant 0 : index
    %c0_7 = arith.constant 0 : index
    %15 = vector.load %arg3[%c0_6, %c0_7] : memref<256x64xbf16, #tpu.memory_space<vmem>>, vector<256x64xbf16>
    %cst_8 = arith.constant dense<0.000000e+00> : vector<16x64xf32>
    %16 = tpu.matmul %14, %15, %cst_8 {dimension_numbers = #tpu.dot_dimension_numbers<[1], [0], [0], [1], [0, 0, 1, 1], [], []>} : vector<16x256xbf16>, vector<256x64xbf16>, vector<16x64xf32> -> vector<16x64xf32>
    %17 = vector.broadcast %2 : vector<1x64xf32> to vector<16x64xf32>
    %18 = arith.addf %16, %17 : vector<16x64xf32>
    %cst_9 = arith.constant 2.000000e-01 : f32
    %19 = vector.broadcast %cst_9 : f32 to vector<16x64xf32>
    %20 = arith.mulf %19, %18 : vector<16x64xf32>
    %21 = arith.maximumf %18, %20 : vector<16x64xf32>
    %22 = tpu.transpose %21, [1, 0] : vector<16x64xf32> -> vector<64x16xf32>
    %cst_10 = arith.constant dense<0.000000e+00> : vector<1x16xf32>
    %23 = tpu.matmul %3, %22, %cst_10 {dimension_numbers = #tpu.dot_dimension_numbers<[1], [0], [0], [1], [0, 0, 1, 1], [], []>} : vector<1x64xf32>, vector<64x16xf32>, vector<1x16xf32> -> vector<1x16xf32>
    %24 = vector.broadcast %4 : vector<1x1xf32> to vector<1x16xf32>
    %25 = arith.addf %23, %24 : vector<1x16xf32>
    %cst_11 = arith.constant 0.000000e+00 : f32
    %26 = vector.broadcast %cst_11 : f32 to vector<1x16xf32>
    %27 = arith.subf %26, %25 : vector<1x16xf32>
    %28 = math.exp %27 : vector<1x16xf32>
    %cst_12 = arith.constant 1.000000e+00 : f32
    %29 = vector.broadcast %cst_12 : f32 to vector<1x16xf32>
    %30 = arith.addf %29, %28 : vector<1x16xf32>
    %31 = tpu.reciprocal %30 {approx = true} : vector<1x16xf32> -> vector<1x16xf32>
    %c0_13 = arith.constant 0 : index
    %c0_14 = arith.constant 0 : index
    %32 = vector.load %arg5[%c0_13, %c0_14] : memref<1x16xf32, #tpu.memory_space<vmem>>, vector<1x16xf32>
    tpu.vector_store %arg5[%c0_13, %c0_14], %31 {strides = array<i32>} : memref<1x16xf32, #tpu.memory_space<vmem>>, vector<1x16xf32>,
    return
  }
  func.func @transform_0(%arg0: i32) -> (i32, i32) {
    %c0_i32 = arith.constant 0 : i32
    %c0_i32_0 = arith.constant 0 : i32
    return %arg0, %c0_i32 : i32, i32
  }
  func.func @transform_1(%arg0: i32) -> (i32, i32) {
    %c0_i32 = arith.constant 0 : i32
    %c0_i32_0 = arith.constant 0 : i32
    %c0_i32_1 = arith.constant 0 : i32
    return %c0_i32, %c0_i32_0 : i32, i32
  }
  func.func @transform_2(%arg0: i32) -> (i32, i32) {
    %c0_i32 = arith.constant 0 : i32
    %c0_i32_0 = arith.constant 0 : i32
    %c0_i32_1 = arith.constant 0 : i32
    return %c0_i32, %c0_i32_0 : i32, i32
  }
  func.func @transform_3(%arg0: i32) -> (i32, i32) {
    %c0_i32 = arith.constant 0 : i32
    %c0_i32_0 = arith.constant 0 : i32
    %c0_i32_1 = arith.constant 0 : i32
    return %c0_i32, %c0_i32_0 : i32, i32
  }
  func.func @transform_4(%arg0: i32) -> (i32, i32) {
    %c0_i32 = arith.constant 0 : i32
    %c0_i32_0 = arith.constant 0 : i32
    return %c0_i32, %arg0 : i32, i32
  }
}

</mosaic_0001>

<bundles_post_ra>
// kernel: interaction_decoder_improved.1
= control target key start
LH: loop header
LB: loop body
LE: loop exit
PB: predicated region body
PF: predicated region fallthrough
CT: control target
= control target key end

     0   :  { %v571_v2 = vmov 0   ;;  %vm90_vm0 = vcmask 523264   ;;  %s706_s0 = inlined_call_operand.vmem [shape: f32[16,64], index: 0, kind: input, shape index: {}]   ;;  %s707_s1 = inlined_call_operand.vmem [shape: bf16[64,256], index: 1, kind: input, shape index: {}]   ;;  %s708_s2 = inlined_call_operand.vmem [shape: bf16[256,64], index: 2, kind: input, shape index: {}]   ;;  %s709_s3 = inlined_call_operand.vmem [shape: f32[4,256], index: 3, kind: input, shape index: {}]   ;;  %s710_s4 = inlined_call_operand.hbm [shape: f32[1,16], index: 4, kind: output, shape index: {}]  }
   0x1   :  { %v515_v0 = vld [vmem:[%s707_s1 + $0x4] ss:$8 sps:$4 sm:$0xff]   ;;  %v517_v1 = vld [vmem:[%s707_s1] ss:$8 sps:$4 sm:$0xff]   ;;  %126 = vmatprep.mubr.bf16.mxu0 %v571_v2  ;;  %514 = vset.pattern.permute.xlu0 %v571_v2  ;;  %v518_v3 = vld [vmem:[%s707_s1 + $0x14] ss:$8 sps:$4 sm:$0xff]  }
   0x2   :  { %94 = vmatprep.subr.bf16.mxu0 %v515_v0  ;;  %v520_v4 = vld [vmem:[%s707_s1 + $0x10] ss:$8 sps:$4 sm:$0xff]   ;;  %v521_v5 = vld [vmem:[%s707_s1 + $0x24] ss:$8 sps:$4 sm:$0xff]   ;;  %v523_v6 = vld [vmem:[%s707_s1 + $0x20] ss:$8 sps:$4 sm:$0xff]  }
   0x3   :  { %95 = vmatpush1.bf16.msra.mxu0 %v517_v1  ;;  %v524_v7 = vld [vmem:[%s707_s1 + $0x34] ss:$8 sps:$4 sm:$0xff]   ;;  %v527_v8 = vld [vmem:[%s708_s2 + $0x40] sm:$0xff]   ;;  %v529_v10 = vld [vmem:[%s708_s2 + $0x48] sm:$0xff]  }
   0x4   :  { %96 = vmatprep.subr.bf16.mxu0 %v518_v3  ;;  %v528_v9 = vld [vmem:[%s708_s2] sm:$0xff]   ;;  %472 = vmatprep.subr.bf16.mxu1 %v527_v8  ;;  %v526_v11 = vld [vmem:[%s707_s1 + $0x30] ss:$8 sps:$4 sm:$0xff]   ;;  %v530_v13 = vld [vmem:[%s708_s2 + $0x8] sm:$0xff]  }
   0x5   :  { %v20_v12 = vld [vmem:[%s706_s0] sm:$0xff]  ;;  %473 = vmatpush3.bf16.msra.mxu1 %v528_v9  ;;  %v531_v14 = vld [vmem:[%s708_s2 + $0x50] sm:$0xff]   ;;  %v21_v15 = vld [vmem:[%s706_s0 + $0x8] sm:$0xff] }
   0x6   :  { %474 = vmatprep.subr.bf16.mxu1 %v529_v10  ;;  %v532_v16 = vld [vmem:[%s708_s2 + $0x10] sm:$0xff]   ;;  %v22_v17 = vpack.c.bf16 %v21_v15, %v20_v12  ;;  %v533_v18 = vld [vmem:[%s708_s2 + $0x58] sm:$0xff]   ;;  %v535_v20 = vld [vmem:[%s708_s2 + $0x60] sm:$0xff]  }
   0x7   :  { %97 = vmatpush1.bf16.msra.mxu0 %v520_v4  ;;  %v534_v19 = vld [vmem:[%s708_s2 + $0x18] sm:$0xff]   ;;  %v662_v21 = vld [vmem:[%s709_s3] sm:$0xff] }
   0x8   :  { %98 = vmatprep.subr.bf16.mxu0 %v521_v5  ;;  %325 = vperm.xlu0 %514, %v662_v21  }
   0x9   :  { %475 = vmatpush3.bf16.msra.mxu1 %v530_v13 }
   0xa   :  { %476 = vmatprep.subr.bf16.mxu1 %v531_v14 }
   0xb   :  { %99 = vmatpush1.bf16.msra.mxu0 %v523_v6 }
   0xc   :  { %100 = vmatprep.subr.bf16.mxu0 %v524_v7 }
   0xd   :  { %477 = vmatpush3.bf16.msra.mxu1 %v532_v16 }
   0xe   :  { %478 = vmatprep.subr.bf16.mxu1 %v533_v18 }
   0xf   :  { %101 = vmatpush1.bf16.msra.mxu0 %v526_v11 }
  0x12   :  { %452 = vmatmul.mubr.msk.bf16.vlgmr.msra.gmra.mrb[0].mxu0 %vm90_vm0, %v22_v17 }
  0x13   :  { %9 = vsyncpa [#allocation3], 0  ;;  %479 = vmatpush3.bf16.msra.mxu1 %v534_v19  ;;  %v536_v22 = vld [vmem:[%s708_s2 + $0x20] sm:$0xff]   ;;  %v537_v23 = vld [vmem:[%s708_s2 + $0x68] sm:$0xff]   ;;  %v32_v29 = vlaneseq  ;;  %v572_v55 = vmov 0.0|0.0   ;;  %vm573_vm1 = vmmov 0  }
  0x14   :  { %480 = vmatprep.subr.bf16.mxu1 %v535_v20  ;;  %v538_v24 = vld [vmem:[%s708_s2 + $0x28] sm:$0xff]   ;;  %v539_v25 = vld [vmem:[%s708_s2 + $0x70] sm:$0xff]   ;;  %v541_v27 = vld [vmem:[%s708_s2 + $0x78] sm:$0xff]   ;;  %504 = vmatprep.subr.bf16.mxu0 %v572_v55  ;;  %v574_v56 = vmov 0.0   ;;  %v575_v10 = vmov 839922192  }
  0x15   :  { %v540_v26 = vld [vmem:[%s708_s2 + $0x30] sm:$0xff]   ;;  %v542_v28 = vld [vmem:[%s708_s2 + $0x38] sm:$0xff]   ;;  %v33_v30 = vshrl.u32 %v32_v29, 7  ;;  %501 = vmatprep.mubr.msk.f32.mxu0 %vm573_vm1, %v574_v56  ;;  %vm506_vm2 = vmpackc.low %vm90_vm0, %vm90_vm0  ;;  %v329_v11 = vunpack.c.l.s4 %v575_v10  ;;  %s576_s2 = smov [#allocation2]   ;;  %vm428_vm3 = vcmask 122880  }
  0x16   :  { %s436_s14 = sshll.u32 %s576_s2, 4  ;;  %s437_s14 = int_to_ptr.vmem [resolvable:$true] %s436_s14 }
  0x17   :  { %481 = vmatpush3.bf16.msra.mxu1 %v536_v22  ;;  %v34_v31 = vsub.s32 0, %v33_v30  ;;  %v38_v32 = vsub.s32 4, %v33_v30  ;;  %v181_v57 = vsub.s32 1, %v33_v30  ;;  %v337_v8 = vsub.s32 2, %v33_v30  ;;  %s547_s15 = scalar_lea.vmem %s437_s14, 16  ;;  %s551_s16 = scalar_lea.vmem %s437_s14, 32 }
  0x18   :  { %482 = vmatprep.subr.bf16.mxu1 %v537_v23  ;;  %v330_v12 = vunpack.c.0.s8 %v329_v11  ;;  %v342_v16 = vsub.s32 3, %v33_v30  ;;  %p548_p0 = scmp.ne.s32.totalorder %s437_s14, %s547_s15  ;;  %p552_p1 = scmp.lt.s32.totalorder %s437_s14, %s437_s14 }
  0x19   :  { %v35_v33 = vrot.slane %v662_v21, %v34_v31  ;;  %v39_v34 = vrot.slane %v662_v21, %v38_v32  ;;  %v182_v59 = vrot.slane %v662_v21, %v181_v57  ;;  %v338_v9 = vrot.slane %v662_v21, %v337_v8  ;;  %p553_p2 = scmp.lt.s32.totalorder %s551_s16, %s547_s15 }
  0x1a   :  { %v333_v13 = vsub.s32 %v330_v12, %v33_v30 }
  0x1b   :  { %483 = vmatpush3.bf16.msra.mxu1 %v538_v24  ;;  %v45_v35 = vrot.slane %v35_v33, %v34_v31  ;;  %v49_v36 = vrot.slane %v39_v34, %v34_v31  ;;  %p554_p3 = por %p553_p2, %p552_p1 }
  0x1c   :  { %484 = vmatprep.subr.bf16.mxu1 %v539_v25 }
  0x1d   :  { %p555_p4 = pnand %p554_p3, %p548_p0 }
  0x1f   :  { %485 = vmatpush3.bf16.msra.mxu1 %v540_v26 }
  0x20   :  { %486 = vmatprep.subr.bf16.mxu1 %v541_v27 }
  0x23   :  { %487 = vmatpush3.bf16.msra.mxu1 %v542_v28 }
  0x87   :  { %v326_v14 = vpop.permute.xlu0 %325 }
  0x88   :  { %v334_v15 = vrot.slane %v326_v14, %v333_v13 }
  0x8a   :  { %v343_v17 = vrot.slane %v334_v15, %v342_v16 }
  0xe5   :  { %v128_v37 = vpop.f32.mrb[0].mxu0 }
  0xe6   :  { %v129_v38 = vadd.f32 %v128_v37, %v45_v35  ;;  %v130_v39 = vpop.f32.mrb[1].mxu0 }
  0xe7   :  { %v131_v40 = vadd.f32 %v130_v39, %v49_v36  ;;  %v132_v41 = vpop.f32.mrb[2].mxu0 }
  0xe8   :  { %v137_v42 = vmul.f32 0.2, %v129_v38  ;;  %v133_v43 = vadd.f32 %v132_v41, %v45_v35  ;;  %v134_v44 = vpop.f32.mrb[3].mxu0 }
  0xe9   :  { %v138_v45 = vmul.f32 0.2, %v131_v40  ;;  %v135_v46 = vadd.f32 %v134_v44, %v49_v36 }
  0xea   :  { %v139_v47 = vmul.f32 0.2, %v133_v43  ;;  %v141_v49 = vmax.f32 %v129_v38, %v137_v42 }
  0xeb   :  { %v140_v48 = vmul.f32 0.2, %v135_v46  ;;  %v142_v51 = vmax.f32 %v131_v40, %v138_v45 }
  0xec   :  { %v143_v50 = vmax.f32 %v133_v43, %v139_v47 }
  0xed   :  { %v144_v52 = vmax.f32 %v135_v46, %v140_v48 }
  0xee   :  { %v145_v53 = vpack.c.bf16 %v143_v50, %v141_v49 }
  0xef   :  { %v146_v54 = vpack.c.bf16 %v144_v52, %v142_v51 }
  0xf1   :  { %311 = vmatprep.mubr.bf16.mxu1 %v146_v54 }
  0xf2   :  { %312 = vmatmul.mubr.bf16.vlgmr.msra.gmra.mrb[0].mxu1 %v145_v53 }
 0x1c5   :  { %v488_v58 = vpop.f32.mrb[0].mxu1 }
 0x1c6   :  { %v489_v60 = vpop.f32.mrb[1].mxu1 }
 0x1c7   :  { %v490_v61 = vadd.f32 %v489_v60, %v488_v58  ;;  %v491_v62 = vpop.f32.mrb[2].mxu1 }
 0x1c8   :  { %v492_v63 = vpop.f32.mrb[3].mxu1 }
 0x1c9   :  { %v314_v0 = vadd.f32 %v490_v61, %v182_v59  ;;  %v493_v1 = vadd.f32 %v492_v63, %v491_v62 }
 0x1cb   :  { %v320_v2 = vmul.f32 0.2, %v314_v0  ;;  %v317_v3 = vadd.f32 %v493_v1, %v182_v59 }
 0x1cd   :  { %v321_v4 = vmul.f32 0.2, %v317_v3  ;;  %v322_v5 = vmax.f32 %v314_v0, %v320_v2 }
 0x1cf   :  { %v323_v6 = vmax.f32 %v317_v3, %v321_v4 }
 0x1d1   :  { %v505_v7 = vpack.c.bf16 %v323_v6, %v322_v5 }
 0x1d3   :  { %507 = vmatpush3.bf16.xpose.msk.msra.mxu0 %vm506_vm2, %v505_v7 }
 0x1da   :  { %502 = vmatmul.mubr.msk.f32.vlgmr.msra.gmra.mrb[4].mxu0 %vm90_vm0, %v338_v9 }
 0x2ad   :  { %v419_v18 = vpop.f32.mrb[4].mxu0 }
 0x2ae   :  { %v420_v19 = vadd.f32 %v419_v18, %v343_v17  ;;  %v503_v20 = vpop.f32.mrb[5].mxu0 }
 0x2b0   :  { %v423_v22 = vsub.f32 0.0, %v420_v19 }
 0x2b2   :  { %v424_v23 = vmul.f32 1.442695, %v423_v22 }
 0x2b4   :  { %543 = vpow2.f32 %v424_v23 }
 0x2be   :  { %v544_v24 = vpop.eup %543 }
 0x2bf   :  { %v426_v25 = vadd.f32 1.0, %v544_v24 }
 0x2c1   :  { %545 = vrcp.f32 %v426_v25 }
 0x2cb   :  { %v546_v21 = vpop.eup %545 }
 0x2cc   :  { %429 = vst.msk [vmem:[#allocation2] sm:$0x1] %vm428_vm3, %v546_v21 }
 0x2cd   :  { %558 = shalt.err (!%p555_p4)
}
 0x2ce   :  { %s559_s1 = scalar_lea.hbm %s710_s4, 16 }
 0x2cf   :  { %p560_p5 = scmp.ne.s32.totalorder %s710_s4, %s559_s1  ;;  %p563_p6 = scmp.lt.u32.totalorder %s559_s1, %s710_s4 }
 0x2d1   :  { %p565_p7 = pnand %p563_p6, %p560_p5 }
 0x2d3   :  { %568 = shalt.err (!%p565_p7)
}
 0x2d4   :  { %439 = dma.vmem_to_hbm [thread:$0]  %s437_s14, 16, %s710_s4, [#allocation3]  }
 0x2d5   :  { %569 = dma.done.wait [#allocation3], 16  }
 0x2d6   :  { %570 = vsyncadd [#allocation3], 4294967280 }
 0x2d7   :  { %443 = vsyncpa [#allocation3], 1 }

</bundles_post_ra>
